<compile_context>
chip_gen: v6e
topology: v6e:2x2x1
jax: 0.10.0
libtpu: 0.0.40
codegen_flags: <defaults>
</compile_context>

<pallas_src>
import functools

import jax
import jax.numpy as jnp
from jax.experimental import pallas as pl
from jax.experimental.pallas import tpu as pltpu


KSIZE = 5
PAD = (KSIZE - 1) // 2
LANE = 128


def _round_up(x, m):
    return (x + m - 1) // m * m


def _postnet_fused_kernel(x_ref, w_ref, scale_ref, bias_ref, o_ref,
                          buf0, buf1, *, seq_len, c_in_real, num_layers):
    """All ConvBNBlocks for one batch element, activations resident in VMEM.

    x_ref:     (1, T, c_in_real)           input (real channels only)
    w_ref:     (L, K*C_pad, C_pad)  bf16   per-layer im2col weights (zero-padded)
    scale_ref: (L, 1, C_pad)        f32    folded BN scale  (gamma/sqrt(var+eps))
    bias_ref:  (L, 1, C_pad)        f32    folded BN bias   (conv bias, mean, beta)
    o_ref:     (1, T, C_pad)               lane-dense output (padded cols are 0)
    buf0/buf1: (T + 2*PAD, C_pad)   f32    ping-pong activation scratch w/ halo
    """
    bufs = (buf0, buf1)
    # Zero both scratch buffers once per batch element: halo rows stay zero for
    # every layer ("same" zero padding) and padded channel columns stay zero.
    buf0[...] = jnp.zeros_like(buf0)
    buf1[...] = jnp.zeros_like(buf1)
    buf0[PAD:PAD + seq_len, :c_in_real] = x_ref[0].astype(buf0.dtype)

    for l in range(num_layers):  # static unroll over the (few) layers
        src = bufs[l % 2]
        x_pad = src[...].astype(jnp.bfloat16)              # (T+2P, C_pad) bf16
        # im2col: fold the 5 taps into the contraction dim -> one MXU matmul.
        unfold = jnp.concatenate(
            [x_pad[k:k + seq_len, :] for k in range(KSIZE)], axis=1)
        acc = jnp.dot(unfold, w_ref[l],
                      preferred_element_type=jnp.float32)  # (T, C_pad) f32
        y = acc * scale_ref[l] + bias_ref[l]                # f32 epilogue
        if l < num_layers - 1:
            y = jnp.tanh(y)
            dst = bufs[(l + 1) % 2]
            dst[PAD:PAD + seq_len, :] = y                   # stays in VMEM
        else:
            o_ref[0] = y.astype(o_ref.dtype)                # lane-dense store


def postnet_forward_btc(x_btc, fused):
    """x_btc: (B, T, C_in_real) channels-last. Returns (B, T, C_out_real)."""
    B, T, c_in = x_btc.shape
    assert c_in == fused["c_in"]
    c_pad = fused["c_pad"]
    L = fused["num_layers"]
    kernel = functools.partial(_postnet_fused_kernel, seq_len=T,
                               c_in_real=c_in, num_layers=L)
    out_padded = pl.pallas_call(
        kernel,
        out_shape=jax.ShapeDtypeStruct((B, T, c_pad), x_btc.dtype),
        grid_spec=pltpu.PrefetchScalarGridSpec(
            num_scalar_prefetch=0,
            grid=(B,),
            in_specs=[
                pl.BlockSpec((1, T, c_in), lambda b: (b, 0, 0)),
                pl.BlockSpec((L, KSIZE * c_pad, c_pad), lambda b: (0, 0, 0)),
                pl.BlockSpec((L, 1, c_pad), lambda b: (0, 0, 0)),
                pl.BlockSpec((L, 1, c_pad), lambda b: (0, 0, 0)),
            ],
            out_specs=pl.BlockSpec((1, T, c_pad), lambda b: (b, 0, 0)),
            scratch_shapes=[
                pltpu.VMEM((T + 2 * PAD, c_pad), jnp.float32),
                pltpu.VMEM((T + 2 * PAD, c_pad), jnp.float32),
            ],
        ),
        compiler_params=pltpu.CompilerParams(
            dimension_semantics=("parallel",)),   # shard batch across v7x TCs
    )(x_btc, fused["w"], fused["scale"], fused["bias"])
    return out_padded[:, :, :fused["c_out"]]


def postnet_forward(x_ncl, fused):
    """PyTorch-layout wrapper: x_ncl (B, C, T) -> (B, C, T).

    NOTE: if the surrounding model already keeps (B, T, C), call
    postnet_forward_btc directly and skip these two glue transposes.
    """
    x_btc = jnp.transpose(x_ncl, (0, 2, 1))
    y_btc = postnet_forward_btc(x_btc, fused)
    return jnp.transpose(y_btc, (0, 2, 1))


def make_postnet_params(key, out_dim, hidden_dim, num_convs):
    """Deterministic synthetic per-layer parameters (PyTorch layout)."""
    dims = [out_dim] + [hidden_dim] * (num_convs - 1) + [out_dim]
    eps = 1e-5
    layers = []
    for i in range(num_convs):
        c_in, c_out = dims[i], dims[i + 1]
        key, k_w, k_b, k_g, k_be = jax.random.split(key, 5)
        # PyTorch Conv1d weight layout: (C_out, C_in, K).
        w_oik = jax.random.normal(k_w, (c_out, c_in, KSIZE), jnp.float32) * 0.1
        conv_b = jax.random.normal(k_b, (c_out,), jnp.float32) * 0.1
        gamma = 1.0 + 0.1 * jax.random.normal(k_g, (c_out,), jnp.float32)
        beta = 0.1 * jax.random.normal(k_be, (c_out,), jnp.float32)
        run_mean = jnp.zeros((c_out,), jnp.float32)
        run_var = jnp.ones((c_out,), jnp.float32)
        # Eval-mode BN fold: y = scale * conv_nobias(x) + bias
        inv_std = 1.0 / jnp.sqrt(run_var + eps)
        scale = gamma * inv_std
        bias = scale * (conv_b - run_mean) + beta
        layers.append(dict(w_oik=w_oik, scale=scale, bias=bias,
                           tanh=(i < num_convs - 1), c_in=c_in, c_out=c_out))
    return layers


def fuse_postnet_params(layers, lane=LANE):
    """Pack per-layer params into lane-dense (zero-padded), stacked arrays.

    Padded channels carry zero weights / zero scale / zero bias, so they stay
    exactly zero through every layer (tanh(0) == 0) and never affect real ones.
    """
    num_layers = len(layers)
    c_pad = _round_up(max(max(p["c_in"], p["c_out"]) for p in layers), lane)
    w_all = jnp.zeros((num_layers, KSIZE, c_pad, c_pad), jnp.float32)
    scale_all = jnp.zeros((num_layers, 1, c_pad), jnp.float32)
    bias_all = jnp.zeros((num_layers, 1, c_pad), jnp.float32)
    for l, p in enumerate(layers):
        c_in, c_out = p["c_in"], p["c_out"]
        w_kic = jnp.transpose(p["w_oik"], (2, 1, 0))        # (K, C_in, C_out)
        w_all = w_all.at[l, :, :c_in, :c_out].set(w_kic)
        scale_all = scale_all.at[l, 0, :c_out].set(p["scale"])
        bias_all = bias_all.at[l, 0, :c_out].set(p["bias"])
    # im2col weight layout: rows ordered [tap0 all c_in, tap1 all c_in, ...].
    w_all = w_all.reshape(num_layers, KSIZE * c_pad, c_pad).astype(jnp.bfloat16)
    return dict(w=w_all, scale=scale_all, bias=bias_all, c_pad=c_pad,
                c_in=layers[0]["c_in"], c_out=layers[-1]["c_out"],
                num_layers=num_layers)


def _reference_forward(x_ncl, layers):
    """Pure-JAX f32 reference using lax.conv for a correctness cross-check."""
    x = x_ncl
    for p in layers:
        y = jax.lax.conv_general_dilated(
            x, p["w_oik"], window_strides=(1,), padding=[(PAD, PAD)],
            dimension_numbers=("NCH", "OIH", "NCH"))
        y = y * p["scale"][None, :, None] + p["bias"][None, :, None]
        if p["tanh"]:
            y = jnp.tanh(y)
        x = y
    return x


if __name__ == "__main__":
    B, OUT_DIM, HIDDEN, T, NUM_CONVS = 2, 16, 32, 16, 3

    key = jax.random.PRNGKey(0)
    key, k_x = jax.random.split(key)
    x = jax.random.normal(k_x, (B, OUT_DIM, T), jnp.float32)  # PyTorch NCL

    layers = make_postnet_params(key, OUT_DIM, HIDDEN, NUM_CONVS)
    fused = fuse_postnet_params(layers)

    out = jax.block_until_ready(postnet_forward(x, fused))
    ref = jax.block_until_ready(_reference_forward(x, layers))

    assert out.shape == (B, OUT_DIM, T)
    max_err = float(jnp.max(jnp.abs(out - ref)))
    # bf16 MXU inputs with f32 accumulation -> loosened tolerance vs f32 ref.
    assert jnp.allclose(out, ref, atol=5e-2, rtol=5e-2), max_err
    print("KERNEL_OK")
</pallas_src>

<mosaic_0001>
module attributes {stable_mosaic.version = 11 : i64} {
  func.func @_postnet_fused_kernel(%arg0: i32, %arg1: memref<1x16x16xf32, #tpu.memory_space<vmem>>, %arg2: memref<3x640x128xbf16, #tpu.memory_space<vmem>>, %arg3: memref<3x1x128xf32, #tpu.memory_space<vmem>>, %arg4: memref<3x1x128xf32, #tpu.memory_space<vmem>>, %arg5: memref<1x16x128xf32, #tpu.memory_space<vmem>>, %arg6: memref<20x128xf32, #tpu.memory_space<vmem>>, %arg7: memref<20x128xf32, #tpu.memory_space<vmem>>) attributes {dimension_semantics = [#tpu.dimension_semantics<parallel>], iteration_bounds = array<i64: 2>, scalar_prefetch = 0 : i64, scratch_operands = 2 : i64, tpu.core_type = #tpu.core_type<tc>, window_params = [{transform_indices = @transform_0, window_bounds = array<i64: 1, 16, 16>}, {pipeline_mode = #tpu.pipeline_mode<synchronous>, transform_indices = @transform_1, window_bounds = array<i64: 3, 640, 128>}, {pipeline_mode = #tpu.pipeline_mode<synchronous>, transform_indices = @transform_2, window_bounds = array<i64: 3, 1, 128>}, {pipeline_mode = #tpu.pipeline_mode<synchronous>, transform_indices = @transform_3, window_bounds = array<i64: 3, 1, 128>}, {transform_indices = @transform_4, window_bounds = array<i64: 1, 16, 128>}]} {
    %cst = arith.constant 0.000000e+00 : f32
    %0 = vector.broadcast %cst : f32 to vector<20x128xf32>
    %c0 = arith.constant 0 : index
    %c0_0 = arith.constant 0 : index
    %1 = vector.load %arg6[%c0, %c0_0] : memref<20x128xf32, #tpu.memory_space<vmem>>, vector<20x128xf32>
    tpu.vector_store %arg6[%c0, %c0_0], %0 {strides = array<i32>} : memref<20x128xf32, #tpu.memory_space<vmem>>, vector<20x128xf32>,
    %cst_1 = arith.constant 0.000000e+00 : f32
    %2 = vector.broadcast %cst_1 : f32 to vector<20x128xf32>
    %c0_2 = arith.constant 0 : index
    %c0_3 = arith.constant 0 : index
    %3 = vector.load %arg7[%c0_2, %c0_3] : memref<20x128xf32, #tpu.memory_space<vmem>>, vector<20x128xf32>
    tpu.vector_store %arg7[%c0_2, %c0_3], %2 {strides = array<i32>} : memref<20x128xf32, #tpu.memory_space<vmem>>, vector<20x128xf32>,
    %c0_4 = arith.constant 0 : index
    %c0_5 = arith.constant 0 : index
    %c0_6 = arith.constant 0 : index
    %4 = vector.load %arg1[%c0_4, %c0_5, %c0_6] : memref<1x16x16xf32, #tpu.memory_space<vmem>>, vector<1x16x16xf32>
    %5 = vector.shape_cast %4 : vector<1x16x16xf32> to vector<16x16xf32>
    %c2 = arith.constant 2 : index
    %c0_7 = arith.constant 0 : index
    %6 = vector.load %arg6[%c2, %c0_7] : memref<20x128xf32, #tpu.memory_space<vmem>>, vector<16x16xf32>
    tpu.vector_store %arg6[%c2, %c0_7], %5 {strides = array<i32>} : memref<20x128xf32, #tpu.memory_space<vmem>>, vector<16x16xf32>,
    %c0_8 = arith.constant 0 : index
    %c0_9 = arith.constant 0 : index
    %7 = vector.load %arg6[%c0_8, %c0_9] : memref<20x128xf32, #tpu.memory_space<vmem>>, vector<20x128xf32>
    %8 = arith.truncf %7 : vector<20x128xf32> to vector<20x128xbf16>
    %9 = vector.extract_strided_slice %8 {offsets = [0, 0], sizes = [16, 128], strides = [1, 1]} : vector<20x128xbf16> to vector<16x128xbf16>
    %10 = vector.extract_strided_slice %8 {offsets = [1, 0], sizes = [16, 128], strides = [1, 1]} : vector<20x128xbf16> to vector<16x128xbf16>
    %11 = vector.extract_strided_slice %8 {offsets = [2, 0], sizes = [16, 128], strides = [1, 1]} : vector<20x128xbf16> to vector<16x128xbf16>
    %12 = vector.extract_strided_slice %8 {offsets = [3, 0], sizes = [16, 128], strides = [1, 1]} : vector<20x128xbf16> to vector<16x128xbf16>
    %13 = vector.extract_strided_slice %8 {offsets = [4, 0], sizes = [16, 128], strides = [1, 1]} : vector<20x128xbf16> to vector<16x128xbf16>
    %14 = tpu.concatenate %9, %10, %11, %12, %13 in 1 : vector<16x128xbf16>, vector<16x128xbf16>, vector<16x128xbf16>, vector<16x128xbf16>, vector<16x128xbf16> -> vector<16x640xbf16>
    %c0_10 = arith.constant 0 : index
    %c0_11 = arith.constant 0 : index
    %c0_12 = arith.constant 0 : index
    %15 = vector.load %arg2[%c0_10, %c0_11, %c0_12] : memref<3x640x128xbf16, #tpu.memory_space<vmem>>, vector<1x640x128xbf16>
    %16 = vector.shape_cast %15 : vector<1x640x128xbf16> to vector<640x128xbf16>
    %cst_13 = arith.constant dense<0.000000e+00> : vector<16x128xf32>
    %17 = tpu.matmul %14, %16, %cst_13 {dimension_numbers = #tpu.dot_dimension_numbers<[1], [0], [0], [1], [0, 0, 1, 1], [], []>} : vector<16x640xbf16>, vector<640x128xbf16>, vector<16x128xf32> -> vector<16x128xf32>
    %c0_14 = arith.constant 0 : index
    %c0_15 = arith.constant 0 : index
    %c0_16 = arith.constant 0 : index
    %18 = vector.load %arg3[%c0_14, %c0_15, %c0_16] : memref<3x1x128xf32, #tpu.memory_space<vmem>>, vector<1x1x128xf32>
    %19 = vector.shape_cast %18 : vector<1x1x128xf32> to vector<1x128xf32>
    %20 = vector.broadcast %19 : vector<1x128xf32> to vector<16x128xf32>
    %21 = arith.mulf %17, %20 : vector<16x128xf32>
    %c0_17 = arith.constant 0 : index
    %c0_18 = arith.constant 0 : index
    %c0_19 = arith.constant 0 : index
    %22 = vector.load %arg4[%c0_17, %c0_18, %c0_19] : memref<3x1x128xf32, #tpu.memory_space<vmem>>, vector<1x1x128xf32>
    %23 = vector.shape_cast %22 : vector<1x1x128xf32> to vector<1x128xf32>
    %24 = vector.broadcast %23 : vector<1x128xf32> to vector<16x128xf32>
    %25 = arith.addf %21, %24 : vector<16x128xf32>
    %26 = math.tanh %25 : vector<16x128xf32>
    %c2_20 = arith.constant 2 : index
    %c0_21 = arith.constant 0 : index
    %27 = vector.load %arg7[%c2_20, %c0_21] : memref<20x128xf32, #tpu.memory_space<vmem>>, vector<16x128xf32>
    tpu.vector_store %arg7[%c2_20, %c0_21], %26 {strides = array<i32>} : memref<20x128xf32, #tpu.memory_space<vmem>>, vector<16x128xf32>,
    %c0_22 = arith.constant 0 : index
    %c0_23 = arith.constant 0 : index
    %28 = vector.load %arg7[%c0_22, %c0_23] : memref<20x128xf32, #tpu.memory_space<vmem>>, vector<20x128xf32>
    %29 = arith.truncf %28 : vector<20x128xf32> to vector<20x128xbf16>
    %30 = vector.extract_strided_slice %29 {offsets = [0, 0], sizes = [16, 128], strides = [1, 1]} : vector<20x128xbf16> to vector<16x128xbf16>
    %31 = vector.extract_strided_slice %29 {offsets = [1, 0], sizes = [16, 128], strides = [1, 1]} : vector<20x128xbf16> to vector<16x128xbf16>
    %32 = vector.extract_strided_slice %29 {offsets = [2, 0], sizes = [16, 128], strides = [1, 1]} : vector<20x128xbf16> to vector<16x128xbf16>
    %33 = vector.extract_strided_slice %29 {offsets = [3, 0], sizes = [16, 128], strides = [1, 1]} : vector<20x128xbf16> to vector<16x128xbf16>
    %34 = vector.extract_strided_slice %29 {offsets = [4, 0], sizes = [16, 128], strides = [1, 1]} : vector<20x128xbf16> to vector<16x128xbf16>
    %35 = tpu.concatenate %30, %31, %32, %33, %34 in 1 : vector<16x128xbf16>, vector<16x128xbf16>, vector<16x128xbf16>, vector<16x128xbf16>, vector<16x128xbf16> -> vector<16x640xbf16>
    %c1 = arith.constant 1 : index
    %c0_24 = arith.constant 0 : index
    %c0_25 = arith.constant 0 : index
    %36 = vector.load %arg2[%c1, %c0_24, %c0_25] : memref<3x640x128xbf16, #tpu.memory_space<vmem>>, vector<1x640x128xbf16>
    %37 = vector.shape_cast %36 : vector<1x640x128xbf16> to vector<640x128xbf16>
    %cst_26 = arith.constant dense<0.000000e+00> : vector<16x128xf32>
    %38 = tpu.matmul %35, %37, %cst_26 {dimension_numbers = #tpu.dot_dimension_numbers<[1], [0], [0], [1], [0, 0, 1, 1], [], []>} : vector<16x640xbf16>, vector<640x128xbf16>, vector<16x128xf32> -> vector<16x128xf32>
    %c1_27 = arith.constant 1 : index
    %c0_28 = arith.constant 0 : index
    %c0_29 = arith.constant 0 : index
    %39 = vector.load %arg3[%c1_27, %c0_28, %c0_29] : memref<3x1x128xf32, #tpu.memory_space<vmem>>, vector<1x1x128xf32>
    %40 = vector.shape_cast %39 : vector<1x1x128xf32> to vector<1x128xf32>
    %41 = vector.broadcast %40 : vector<1x128xf32> to vector<16x128xf32>
    %42 = arith.mulf %38, %41 : vector<16x128xf32>
    %c1_30 = arith.constant 1 : index
    %c0_31 = arith.constant 0 : index
    %c0_32 = arith.constant 0 : index
    %43 = vector.load %arg4[%c1_30, %c0_31, %c0_32] : memref<3x1x128xf32, #tpu.memory_space<vmem>>, vector<1x1x128xf32>
    %44 = vector.shape_cast %43 : vector<1x1x128xf32> to vector<1x128xf32>
    %45 = vector.broadcast %44 : vector<1x128xf32> to vector<16x128xf32>
    %46 = arith.addf %42, %45 : vector<16x128xf32>
    %47 = math.tanh %46 : vector<16x128xf32>
    %c2_33 = arith.constant 2 : index
    %c0_34 = arith.constant 0 : index
    %48 = vector.load %arg6[%c2_33, %c0_34] : memref<20x128xf32, #tpu.memory_space<vmem>>, vector<16x128xf32>
    tpu.vector_store %arg6[%c2_33, %c0_34], %47 {strides = array<i32>} : memref<20x128xf32, #tpu.memory_space<vmem>>, vector<16x128xf32>,
    %c0_35 = arith.constant 0 : index
    %c0_36 = arith.constant 0 : index
    %49 = vector.load %arg6[%c0_35, %c0_36] : memref<20x128xf32, #tpu.memory_space<vmem>>, vector<20x128xf32>
    %50 = arith.truncf %49 : vector<20x128xf32> to vector<20x128xbf16>
    %51 = vector.extract_strided_slice %50 {offsets = [0, 0], sizes = [16, 128], strides = [1, 1]} : vector<20x128xbf16> to vector<16x128xbf16>
    %52 = vector.extract_strided_slice %50 {offsets = [1, 0], sizes = [16, 128], strides = [1, 1]} : vector<20x128xbf16> to vector<16x128xbf16>
    %53 = vector.extract_strided_slice %50 {offsets = [2, 0], sizes = [16, 128], strides = [1, 1]} : vector<20x128xbf16> to vector<16x128xbf16>
    %54 = vector.extract_strided_slice %50 {offsets = [3, 0], sizes = [16, 128], strides = [1, 1]} : vector<20x128xbf16> to vector<16x128xbf16>
    %55 = vector.extract_strided_slice %50 {offsets = [4, 0], sizes = [16, 128], strides = [1, 1]} : vector<20x128xbf16> to vector<16x128xbf16>
    %56 = tpu.concatenate %51, %52, %53, %54, %55 in 1 : vector<16x128xbf16>, vector<16x128xbf16>, vector<16x128xbf16>, vector<16x128xbf16>, vector<16x128xbf16> -> vector<16x640xbf16>
    %c2_37 = arith.constant 2 : index
    %c0_38 = arith.constant 0 : index
    %c0_39 = arith.constant 0 : index
    %57 = vector.load %arg2[%c2_37, %c0_38, %c0_39] : memref<3x640x128xbf16, #tpu.memory_space<vmem>>, vector<1x640x128xbf16>
    %58 = vector.shape_cast %57 : vector<1x640x128xbf16> to vector<640x128xbf16>
    %cst_40 = arith.constant dense<0.000000e+00> : vector<16x128xf32>
    %59 = tpu.matmul %56, %58, %cst_40 {dimension_numbers = #tpu.dot_dimension_numbers<[1], [0], [0], [1], [0, 0, 1, 1], [], []>} : vector<16x640xbf16>, vector<640x128xbf16>, vector<16x128xf32> -> vector<16x128xf32>
    %c2_41 = arith.constant 2 : index
    %c0_42 = arith.constant 0 : index
    %c0_43 = arith.constant 0 : index
    %60 = vector.load %arg3[%c2_41, %c0_42, %c0_43] : memref<3x1x128xf32, #tpu.memory_space<vmem>>, vector<1x1x128xf32>
    %61 = vector.shape_cast %60 : vector<1x1x128xf32> to vector<1x128xf32>
    %62 = vector.broadcast %61 : vector<1x128xf32> to vector<16x128xf32>
    %63 = arith.mulf %59, %62 : vector<16x128xf32>
    %c2_44 = arith.constant 2 : index
    %c0_45 = arith.constant 0 : index
    %c0_46 = arith.constant 0 : index
    %64 = vector.load %arg4[%c2_44, %c0_45, %c0_46] : memref<3x1x128xf32, #tpu.memory_space<vmem>>, vector<1x1x128xf32>
    %65 = vector.shape_cast %64 : vector<1x1x128xf32> to vector<1x128xf32>
    %66 = vector.broadcast %65 : vector<1x128xf32> to vector<16x128xf32>
    %67 = arith.addf %63, %66 : vector<16x128xf32>
    %c0_47 = arith.constant 0 : index
    %c0_48 = arith.constant 0 : index
    %c0_49 = arith.constant 0 : index
    %68 = vector.load %arg5[%c0_47, %c0_48, %c0_49] : memref<1x16x128xf32, #tpu.memory_space<vmem>>, vector<1x16x128xf32>
    %69 = vector.shape_cast %68 : vector<1x16x128xf32> to vector<16x128xf32>
    %70 = vector.shape_cast %67 : vector<16x128xf32> to vector<1x16x128xf32>
    tpu.vector_store %arg5[%c0_47, %c0_48, %c0_49], %70 {strides = array<i32>} : memref<1x16x128xf32, #tpu.memory_space<vmem>>, vector<1x16x128xf32>,
    return
  }
  func.func @transform_0(%arg0: i32) -> (i32, i32, i32) {
    %c0_i32 = arith.constant 0 : i32
    %c0_i32_0 = arith.constant 0 : i32
    %c0_i32_1 = arith.constant 0 : i32
    return %arg0, %c0_i32, %c0_i32_0 : i32, i32, i32
  }
  func.func @transform_1(%arg0: i32) -> (i32, i32, i32) {
    %c0_i32 = arith.constant 0 : i32
    %c0_i32_0 = arith.constant 0 : i32
    %c0_i32_1 = arith.constant 0 : i32
    %c0_i32_2 = arith.constant 0 : i32
    return %c0_i32, %c0_i32_0, %c0_i32_1 : i32, i32, i32
  }
  func.func @transform_2(%arg0: i32) -> (i32, i32, i32) {
    %c0_i32 = arith.constant 0 : i32
    %c0_i32_0 = arith.constant 0 : i32
    %c0_i32_1 = arith.constant 0 : i32
    %c0_i32_2 = arith.constant 0 : i32
    return %c0_i32, %c0_i32_0, %c0_i32_1 : i32, i32, i32
  }
  func.func @transform_3(%arg0: i32) -> (i32, i32, i32) {
    %c0_i32 = arith.constant 0 : i32
    %c0_i32_0 = arith.constant 0 : i32
    %c0_i32_1 = arith.constant 0 : i32
    %c0_i32_2 = arith.constant 0 : i32
    return %c0_i32, %c0_i32_0, %c0_i32_1 : i32, i32, i32
  }
  func.func @transform_4(%arg0: i32) -> (i32, i32, i32) {
    %c0_i32 = arith.constant 0 : i32
    %c0_i32_0 = arith.constant 0 : i32
    %c0_i32_1 = arith.constant 0 : i32
    return %arg0, %c0_i32, %c0_i32_0 : i32, i32, i32
  }
}

</mosaic_0001>

<bundles_post_ra>
// kernel: tpu_custom_call.1
= control target key start
LH: loop header
LB: loop body
LE: loop exit
PB: predicated region body
PF: predicated region fallthrough
CT: control target
= control target key end

     0   :  { %9 = vsyncpa [#allocation5], 0  ;;  %s2902_s0 = inlined_call_operand.hbm [shape: f32[2,16,16], index: 0, kind: input, shape index: {}]   ;;  %s2903_s1 = inlined_call_operand.hbm [shape: bf16[3,640,128], index: 1, kind: input, shape index: {}]   ;;  %s2904_s2 = inlined_call_operand.vmem [shape: f32[3,1,128], index: 2, kind: input, shape index: {}]   ;;  %s2905_s3 = inlined_call_operand.hbm [shape: f32[3,1,128], index: 3, kind: input, shape index: {}]   ;;  %s2906_s4 = inlined_call_operand.hbm [shape: f32[2,16,128], index: 4, kind: output, shape index: {}]  }
   0x1   :  { %11 = vsyncpa [#allocation5 + $0x1], 0 }
   0x2   :  { %12 = vsyncpa [#allocation8], 0 }
   0x3   :  { %13 = vsyncpa [#allocation6], 0 }
   0x4   :  { %15 = vsyncpa [#allocation6 + $0x1], 0  ;;  %s2641_s15 = smov 0   ;;  %s2643_s16 = smov 0  }
   0x5   :  { %s2645_s17 = smov 0   ;;  %s2647_s18 = smov 0  }
   0x6 LB: > { %s2662_s19 = sadd.s32 4294967295, %s2600_s18   ;;  %s1880_s20 = sadd.s32 4294967294, %s2600_s18   ;;  %s2600_s18 = sphi %s2647_s18, %s2927_s18   ;;  %s2596_s17 = sphi %s2645_s17, %s2926_s17   ;;  %s2592_s16 = sphi %s2643_s16, %s2925_s16   ;;  %s2588_s15 = sphi %s2641_s15, %s2924_s15  }
   0x7   : > { %p41_p0 = scmp.ne.s32.totalorder %s2592_s16, %s2588_s15  ;;  %p2907_p1 = scmp.eq.s32.totalorder %s2662_s19, 0 }
   0x8   : > { %p128_p2 = scmp.eq.s32.totalorder %s2662_s19, 1  ;;  %p134_p3 = scmp.eq.s32.totalorder %s1880_s20, 1 }
   0x9   : > { %p2671_p4 = por %p2907_p1, %p41_p0  ;;  %p1881_p5 = scmp.ge.s32.totalorder %s2600_s18, 1 }
   0xa   : > { %p2676_p6 = por %p134_p3, %p41_p0  ;;  %p141_p7 = scmp.lt.s32.totalorder %s2600_s18, 3 }
   0xb   : > { %s2911_s21 = scalar_select %p2671_p4, 1, 0 }
   0xc   : > { %s2912_s22 = scalar_select %p2676_p6, 1, 0 }
   0xd   : > { %p2681_p8 = pnand %p1881_p5, %p141_p7  ;;  %s2602_s24 = smov [#allocation7]  }
   0xe   : > { %s153_s25 = sshll.u32 %s2602_s24, 4  ;;  %s2603_s27 = smov [#allocation9]   ;;  %s154_s25 = int_to_ptr.vmem [resolvable:$true] %s153_s25 }
   0xf   : > { %s2913_s23 = scalar_select %p2681_p8, 1, 0 }
  0x10   : > { %p2259_p9 = pneg %p2681_p8  ;;  %s169_s28 = sshll.u32 %s2603_s27, 4  ;;  %s2694_s28 = int_to_ptr.vmem [resolvable:$true] %s169_s28 }
  0x11   : > { %s2463_s29 = scalar_lea.vmem %s154_s25, 15360  ;;  %p2471_p5 = scmp.lt.s32.totalorder %s154_s25, %s154_s25 }
  0x12   : > { %p2690_p11 = pnand %p2259_p9, %p2907_p1  ;;  %p2464_p13 = scmp.ne.s32.totalorder %s154_s25, %s2463_s29 }
  0x13   : > { %p2472_p7 = scmp.lt.s32.totalorder %s2463_s29, %s2463_s29 }
  0x14   : > { %p2454_p12 = pneg %p2690_p11 }
  0x15   : > { %p2473_p9 = por %p2472_p7, %p2471_p5 }
  0x16   : > { %p2466_p0 = pnand %p2464_p13, %p2454_p12 }
  0x18   : > { %p2467_p3 = pneg %p2466_p0 }
  0x1a   : > { %p2474_p10 = pnand %p2473_p9, %p2467_p3 }
  0x1c   : > { %2477 = shalt.err (!%p2474_p10)
}
  0x1d   : > { %s2604_s30 = smov 64   ;;  %s2605_s5 = smov 4  }
  0x1e   : > { %2262 = dma.hbm_to_vmem [thread:$0]  (!%p2690_p11), %s2903_s1, 15360, %s154_s25, [#allocation8], %s2604_s30, %s2604_s30, %s2605_s5  }
  0x1f   : > { %s2489_s8 = scalar_lea.vmem %s2694_s28, 48  ;;  %s2496_s9 = scalar_lea.vmem %s2694_s28, 64 }
  0x20   : > { %p2490_p13 = scmp.ne.s32.totalorder %s2694_s28, %s2489_s8  ;;  %p2497_p10 = scmp.lt.s32.totalorder %s2694_s28, %s2694_s28 }
  0x21   : > { %p2498_p5 = scmp.lt.s32.totalorder %s2496_s9, %s2489_s8 }
  0x22   : > { %p2492_p0 = pnand %p2490_p13, %p2454_p12 }
  0x23   : > { %p2499_p7 = por %p2498_p5, %p2497_p10 }
  0x24   : > { %p2493_p3 = pneg %p2492_p0 }
  0x26   : > { %p2500_p9 = pnand %p2499_p7, %p2493_p3 }
  0x28   : > { %2503 = shalt.err (!%p2500_p9)
}
  0x29   : > { %s2606_s10 = smov 16   ;;  %s2607_s11 = smov 1  }
  0x2a   : > { %2265 = dma.hbm_to_vmem [thread:$0]  (!%p2690_p11), %s2905_s3, 48, %s2694_s28, [#allocation8], %s2606_s10, %s2606_s10, %s2607_s11  }
  0x2b   : > { %s2721_s14 = sadd.s32 1, %s2600_s18   ;;  %s28_s24 = sadd.s32 1, %s2596_s17 }
  0x2c   : > { %s25_s20 = ssub.s32 %s2600_s18, %s2721_s14  ;;  %p35_p13 = scmp.ne.s32.totalorder %s2596_s17, %s2592_s16 }
  0x2d   : > { %p26_p12 = scmp.eq.s32.totalorder %s25_s20, 0  ;;  %p36_p0 = scmp.eq.s32.totalorder %s2600_s18, 0 }
  0x2e   : > { %p2734_p10 = por %p128_p2, %p35_p13  ;;  %p2276_p5 = scmp.lt.s32.totalorder %s2600_s18, 2 }
  0x2f   : > { %s2730_s25 = scalar_select %p26_p12, %s2596_s17, %s28_s24  }
  0x30   : > { %p37_p3 = por %p36_p0, %p35_p13  ;;  %s183_s26 = sand.u32 1, %s2596_s17  }
  0x31   : > { %s2915_s27 = scalar_select %p2734_p10, 1, 0 }
  0x32   : > { %s1885_s29 = sshll.u32 %s183_s26, 4  ;;  %s2026_s28 = sshll.u32 %s2600_s18, 8 }
  0x33   : > { %s2744_s6 = scalar_lea.hbm %s2902_s0, %s2026_s28  ;;  %s187_s7 = scalar_lea.vmem [#allocation4], %s1885_s29 }
  0x34   : > { %s194_s8 = sshll.u32 %s187_s7, 4  ;;  %p2748_p2 = pnand %p2276_p5, %p37_p3  ;;  %s2746_s8 = int_to_ptr.vmem [resolvable:$true] %s194_s8 }
  0x35   : > { %s2752_s10 = scalar_lea.sflag [#allocation5], %s183_s26  ;;  %s2504_s11 = scalar_lea.hbm %s2744_s6, 256 }
  0x36   : > { %p2505_p11 = scmp.ne.s32.totalorder %s2744_s6, %s2504_s11  ;;  %p2506_p7 = pneg %p2748_p2 }
  0x37   : > { %s2509_s20 = scalar_lea.hbm %s2902_s0, 512  ;;  %p2510_p13 = scmp.lt.s32.totalorder %s2744_s6, %s2902_s0 }
  0x38   : > { %p2507_p9 = pnand %p2506_p7, %p2505_p11  ;;  %p2511_p0 = scmp.lt.s32.totalorder %s2509_s20, %s2504_s11 }
  0x3a   : > { %p2508_p12 = pneg %p2507_p9  ;;  %p2512_p3 = por %p2511_p0, %p2510_p13 }
  0x3c   : > { %p2513_p5 = pnand %p2512_p3, %p2508_p12 }
  0x3e   : > { %2516 = shalt.err (!%p2513_p5)
}
  0x3f   : > { %s2517_s26 = scalar_lea.vmem %s2746_s8, 256  ;;  %s2608_s28 = smov [#allocation4]  }
  0x40   : > { %p2518_p1 = scmp.ne.s32.totalorder %s2746_s8, %s2517_s26  ;;  %s2522_s30 = sshll.u32 %s2608_s28, 4  ;;  %s2523_s30 = int_to_ptr.vmem [resolvable:$false] %s2522_s30 }
  0x41   : > { %s2524_s5 = scalar_lea.vmem %s2523_s30, 512  ;;  %p2525_p9 = scmp.lt.s32.totalorder %s2746_s8, %s2523_s30 }
  0x42   : > { %p2520_p6 = pnand %p2518_p1, %p2506_p7  ;;  %p2526_p10 = scmp.lt.s32.totalorder %s2524_s5, %s2517_s26 }
  0x44   : > { %p2521_p11 = pneg %p2520_p6  ;;  %p2527_p4 = por %p2526_p10, %p2525_p9 }
  0x46   : > { %p2528_p8 = pnand %p2527_p4, %p2521_p11 }
  0x48   : > { %2531 = shalt.err (!%p2528_p8)
}
  0x49   : > { %s2609_s7 = smov 128   ;;  %s2610_s11 = smov 8  }
  0x4a   : > { %2269 = dma.hbm_to_vmem [thread:$0]  (!%p2748_p2), %s2744_s6, 256, %s2746_s8, %s2752_s10, %s2609_s7, %s2609_s7, %s2610_s11  }
  0x4b   : > { %p2917_p1 = scmp.ne.s32.totalorder %s2913_s23, 0 }
  0x4c   : > { %s2776_s12 = sand.u32 (!%p2917_p1), 1, %s2592_s16   ;;  %p2918_p4 = scmp.ne.s32.totalorder (!%p2917_p1), %s2911_s21, 0 }
  0x4d   : > { %206 = sbr.rel (%p2917_p1) target bundleno = 903 (0x387), region = 36  ;;  %s1889_s13 = sshll.u32 (!%p2917_p1), %s2776_s12, 4 }
  0x4e   : > { %s209_s20 = scalar_lea.sflag (!%p2917_p1), [#allocation5], %s2776_s12  ;;  %s2782_s24 = scalar_lea.vmem (!%p2917_p1), [#allocation4], %s1889_s13 }
  0x52   : > { %2575 = dma.done.wait (%p2918_p4), %s209_s20, 256  }
  0x53   : > { %2577 = vsyncadd (%p2918_p4), %s209_s20, 4294967040  ;;  %p2919_p6 = scmp.eq.s32.totalorder %s2662_s19, 0 }
  0x55   : > { %2579 = dma.done.wait (%p2919_p6), [#allocation8], 15408   ;;  %p2920_p8 = pmov %p2919_p6 }
  0x56   : > { %v2611_v0 = vmov 0.0   ;;  %v2324_v1 = vld [vmem:[#allocation7 + $0x78] sm:$0xff]   ;;  %v2328_v5 = vld [vmem:[#allocation7 + $0x70] sm:$0xff]   ;;  %v2332_v9 = vld [vmem:[#allocation7 + $0x68] sm:$0xff]   ;;  %vm254_vm0 = vcmask 130048   ;;  %vm278_vm3 = vcmask 1046528  }
  0x57   : > { %2581 = vsyncadd (%p2920_p8), [#allocation8], 4294951888  ;;  %246 = vst [vmem:[#allocation2] sm:$0xff] %v2611_v0  ;;  %v2325_v2 = vld [vmem:[#allocation7 + $0xf8] sm:$0xff]   ;;  %2028 = vmatprep.subr.bf16.mxu0 %v2324_v1  ;;  %v2329_v6 = vld [vmem:[#allocation7 + $0xf0] sm:$0xff]   ;;  %vm2612_vm4 = vmmov 0  }
  0x58   : > { %247 = vst [vmem:[#allocation2 + $0x8] sm:$0xff] %v2611_v0  ;;  %248 = vst [vmem:[#allocation2 + $0x10] sm:$0xf] %v2611_v0  ;;  %v2326_v3 = vld [vmem:[#allocation7 + $0x38] sm:$0xff]   ;;  %2050 = vmatprep.subr.bf16.mxu1 %v2325_v2  ;;  %v2330_v7 = vld [vmem:[#allocation7 + $0x30] sm:$0xff]   ;;  %vm294_vm5 = vcmask 1045504  }
  0x59   : > { %249 = vst [vmem:[#allocation3] sm:$0xff] %v2611_v0  ;;  %250 = vst [vmem:[#allocation3 + $0x8] sm:$0xff] %v2611_v0  ;;  %v2327_v4 = vld [vmem:[#allocation7 + $0xb8] sm:$0xff]   ;;  %2029 = vmatpush3.bf16.msra.mxu0 %v2326_v3  ;;  %v2331_v8 = vld [vmem:[#allocation7 + $0xb0] sm:$0xff]   ;;  %vm262_vm1 = vsmask.f32 7424 }
  0x5a   : > { %251 = vst [vmem:[#allocation3 + $0x10] sm:$0xf] %v2611_v0  ;;  %2051 = vmatpush3.bf16.msra.mxu1 %v2327_v4  ;;  %2030 = vmatprep.subr.bf16.mxu0 %v2328_v5  ;;  %v2333_v10 = vld [vmem:[#allocation7 + $0xe8] sm:$0xff]   ;;  %v2336_v13 = vld [vmem:[#allocation7 + $0x60] sm:$0xff]   ;;  %v2340_v17 = vld [vmem:[#allocation7 + $0x58] sm:$0xff]   ;;  %s244_s29 = scalar_lea.vmem [#allocation10], %s1889_s13 }
  0x5b   : > { %2052 = vmatprep.subr.bf16.mxu1 %v2329_v6  ;;  %v2334_v11 = vld [vmem:[#allocation7 + $0x28] sm:$0xff]   ;;  %v2337_v14 = vld [vmem:[#allocation7 + $0xe0] sm:$0xff]   ;;  %v2341_v18 = vld [vmem:[#allocation7 + $0xd8] sm:$0xff]   ;;  %vm283_vm2 = vsmask.f32 6400  ;;  %s1788_s26 = sshll.u32 %s244_s29, 4  ;;  %s2854_s26 = int_to_ptr.vmem [resolvable:$true] %s1788_s26 }
  0x5c   : > { %v2335_v12 = vld [vmem:[#allocation7 + $0xa8] sm:$0xff]   ;;  %v2338_v15 = vld [vmem:[#allocation7 + $0x20] sm:$0xff]   ;;  %v2342_v19 = vld [vmem:[#allocation7 + $0x18] sm:$0xff]   ;;  %s2027_s28 = sshll.u32 %s2662_s19, 8  ;;  %s1775_s11 = scalar_lea.sflag [#allocation6], %s2776_s12 }
  0x5d   : > { %2031 = vmatpush3.bf16.msra.mxu0 %v2330_v7  ;;  %v2339_v16 = vld [vmem:[#allocation7 + $0xa0] sm:$0xff]   ;;  %v2343_v20 = vld [vmem:[#allocation7 + $0x98] sm:$0xff]   ;;  %v2344_v21 = vld [vmem:[#allocation7 + $0x50] sm:$0xff]   ;;  %s2859_s7 = scalar_lea.hbm %s2906_s4, %s2027_s28  ;;  %s2532_s13 = scalar_lea.vmem %s2854_s26, 256 }
  0x5e   : > { %2053 = vmatpush3.bf16.msra.mxu1 %v2331_v8  ;;  %2032 = vmatprep.subr.bf16.mxu0 %v2332_v9  ;;  %v2345_v22 = vld [vmem:[#allocation7 + $0xd0] sm:$0xff]   ;;  %v2348_v25 = vld [vmem:[#allocation7 + $0x48] sm:$0xff]   ;;  %v2352_v29 = vld [vmem:[#allocation7 + $0x40] sm:$0xff]   ;;  %p2533_p10 = scmp.ne.s32.totalorder %s2854_s26, %s2532_s13  ;;  %p2921_p2 = scmp.ne.s32.totalorder %s2915_s27, 0 }
  0x5f   : > { %2054 = vmatprep.subr.bf16.mxu1 %v2333_v10  ;;  %v2346_v23 = vld [vmem:[#allocation7 + $0x10] sm:$0xff]   ;;  %v2349_v26 = vld [vmem:[#allocation7 + $0xc8] sm:$0xff]   ;;  %v2353_v30 = vld [vmem:[#allocation7 + $0xc0] sm:$0xff]   ;;  %s2613_s19 = smov [#allocation10]  }
  0x60   : > { %v2347_v24 = vld [vmem:[#allocation7 + $0x90] sm:$0xff]   ;;  %v2350_v27 = vld [vmem:[#allocation7 + $0x8] sm:$0xff]   ;;  %v2354_v31 = vld [vmem:[#allocation7] sm:$0xff]   ;;  %p2534_p7 = pnand %p2533_p10, %p2921_p2  ;;  %s2536_s20 = sshll.u32 %s2613_s19, 4  ;;  %s2537_s20 = int_to_ptr.vmem [resolvable:$false] %s2536_s20 }
  0x61   : > { %2033 = vmatpush3.bf16.msra.mxu0 %v2334_v11  ;;  %v2351_v28 = vld [vmem:[#allocation7 + $0x88] sm:$0xff]   ;;  %v2355_v32 = vld [vmem:[#allocation7 + $0x80] sm:$0xff]   ;;  %v2356_v54 = vld [vmem:[#allocation7 + $0x138] sm:$0xff]   ;;  %p2539_p13 = scmp.lt.s32.totalorder %s2854_s26, %s2537_s20 }
  0x62   : > { %2055 = vmatpush3.bf16.msra.mxu1 %v2335_v12  ;;  %2034 = vmatprep.subr.bf16.mxu0 %v2336_v13  ;;  %v252_v33 = vld [vmem:[%s2782_s24] sm:$0xff]  ;;  %v253_v34 = vld [vmem:[%s2782_s24 + $0x8] sm:$0xff]  ;;  %p2535_p12 = pneg %p2534_p7  ;;  %s2538_s24 = scalar_lea.vmem %s2537_s20, 512 }
  0x63   : > { %2056 = vmatprep.subr.bf16.mxu1 %v2337_v14  ;;  %255 = vst.msk [vmem:[#allocation2 + $0x2] sm:$0xff] %vm254_vm0, %v252_v33  ;;  %256 = vst.msk [vmem:[#allocation2 + $0xa] sm:$0xff] %vm254_vm0, %v253_v34  ;;  %v2357_v61 = vld [vmem:[#allocation7 + $0x130] sm:$0xff]   ;;  %v2358_v62 = vld [vmem:[#allocation7 + $0x128] sm:$0xff]   ;;  %p2540_p0 = scmp.lt.s32.totalorder %s2538_s24, %s2532_s13 }
  0x64   : > { %v2359_v63 = vld [vmem:[#allocation7 + $0x120] sm:$0xff]   ;;  %v2360_v1 = vld [vmem:[#allocation7 + $0x118] sm:$0xff]   ;;  %v2361_v2 = vld [vmem:[#allocation7 + $0x110] sm:$0xff]  }
  0x65   : > { %2035 = vmatpush3.bf16.msra.mxu0 %v2338_v15  ;;  %v2362_v3 = vld [vmem:[#allocation7 + $0x108] sm:$0xff]   ;;  %v2363_v4 = vld [vmem:[#allocation7 + $0x100] sm:$0xff]   ;;  %v2364_v6 = vld [vmem:[#allocation7 + $0x1b8] sm:$0xff]   ;;  %p2541_p3 = por %p2540_p0, %p2539_p13 }
  0x66   : > { %2057 = vmatpush3.bf16.msra.mxu1 %v2339_v16  ;;  %2036 = vmatprep.subr.bf16.mxu0 %v2340_v17  ;;  %v2365_v7 = vld [vmem:[#allocation7 + $0x178] sm:$0xff]   ;;  %v2368_v10 = vld [vmem:[#allocation7 + $0x1b0] sm:$0xff]   ;;  %v2372_v14 = vld [vmem:[#allocation7 + $0x1a8] sm:$0xff]  }
  0x67   : > { %2058 = vmatprep.subr.bf16.mxu1 %v2341_v18  ;;  %v2366_v8 = vld [vmem:[#allocation7 + $0x238] sm:$0xff]   ;;  %v2369_v11 = vld [vmem:[#allocation7 + $0x170] sm:$0xff]   ;;  %v2373_v15 = vld [vmem:[#allocation7 + $0x168] sm:$0xff]   ;;  %p2542_p5 = pnand %p2541_p3, %p2535_p12 }
  0x68   : > { %v2367_v9 = vld [vmem:[#allocation7 + $0x1f8] sm:$0xff]   ;;  %v2370_v12 = vld [vmem:[#allocation7 + $0x230] sm:$0xff]   ;;  %v2374_v16 = vld [vmem:[#allocation7 + $0x228] sm:$0xff]  }
  0x69   : > { %2037 = vmatpush3.bf16.msra.mxu0 %v2342_v19  ;;  %v2371_v13 = vld [vmem:[#allocation7 + $0x1f0] sm:$0xff]   ;;  %v2375_v17 = vld [vmem:[#allocation7 + $0x1e8] sm:$0xff]   ;;  %v2376_v18 = vld [vmem:[#allocation7 + $0x1a0] sm:$0xff]  }
  0x6a   : > { %2059 = vmatpush3.bf16.msra.mxu1 %v2343_v20  ;;  %2038 = vmatprep.subr.bf16.mxu0 %v2344_v21  ;;  %v257_v35 = vld [vmem:[#allocation2] sm:$0xff]  ;;  %v258_v36 = vld [vmem:[#allocation2 + $0x8] sm:$0xff]  ;;  %v259_v37 = vld [vmem:[#allocation2 + $0x10] sm:$0xf] }
  0x6b   : > { %2060 = vmatprep.subr.bf16.mxu1 %v2345_v22  ;;  %v260_v38 = vpack.c.bf16 %v258_v36, %v257_v35  ;;  %v261_v39 = vpack.c.bf16 %v259_v37, %v259_v37  ;;  %v2377_v19 = vld [vmem:[#allocation7 + $0x160] sm:$0xff]   ;;  %v2380_v22 = vld [vmem:[#allocation7 + $0x198] sm:$0xff]   ;;  %v2391_v33 = vld [vmem:[#allocation7 + $0x1c8] sm:$0xff]  }
  0x6c   : > { %v2378_v20 = vld [vmem:[#allocation7 + $0x220] sm:$0xff]  }
  0x6d   : > { %2039 = vmatpush3.bf16.msra.mxu0 %v2346_v23  ;;  %v264_v40 = vshrl.u32 %v260_v38, 16  ;;  %v266_v41 = vshll.u32 %v260_v38, 16  ;;  %v271_v42 = vshll.u32 %v261_v39, 16  ;;  %v287_v43 = vshrl.u32 %v261_v39, 16  ;;  %v2379_v21 = vld [vmem:[#allocation7 + $0x1e0] sm:$0xff]   ;;  %v2381_v23 = vld [vmem:[#allocation7 + $0x158] sm:$0xff]  }
  0x6e   : > { %2061 = vmatpush3.bf16.msra.mxu1 %v2347_v24  ;;  %2040 = vmatprep.subr.bf16.mxu0 %v2348_v25  ;;  %v279_v44 = vrot.slane %v260_v38, 1  ;;  %v280_v45 = vrot.slane %v261_v39, 1  ;;  %v295_v46 = vrot.slane %v260_v38, 2  ;;  %v296_v47 = vrot.slane %v261_v39, 2  ;;  %v2382_v24 = vld [vmem:[#allocation7 + $0x218] sm:$0xff]   ;;  %v2392_v34 = vld [vmem:[#allocation7 + $0x180] sm:$0xff]  }
  0x6f   : > { %2062 = vmatprep.subr.bf16.mxu1 %v2349_v26  ;;  %v268_v48 = vrot.slane %v266_v41, 1  ;;  %v273_v49 = vrot.slane %v271_v42, 1  ;;  %v284_v50 = vrot.slane %v264_v40, 1  ;;  %v285_v51 = vrot.slane %v266_v41, 2  ;;  %v2383_v25 = vld [vmem:[#allocation7 + $0x1d8] sm:$0xff]   ;;  %v2384_v26 = vld [vmem:[#allocation7 + $0x190] sm:$0xff]  }
  0x70   : > { %v289_v52 = vrot.slane %v287_v43, 1  ;;  %v290_v53 = vrot.slane %v271_v42, 2  ;;  %v281_v59 = vsel %vm278_vm3, %v279_v44, %v280_v45  ;;  %v297_v5 = vsel %vm294_vm5, %v295_v46, %v296_v47  ;;  %v2394_v35 = vld [vmem:[#allocation7 + $0x200] sm:$0xff]  }
  0x71   : > { %2041 = vmatpush3.bf16.msra.mxu0 %v2350_v27  ;;  %v269_v55 = vor.u32 %v268_v48, %v264_v40  ;;  %v286_v56 = vor.u32 %v285_v51, %v284_v50  ;;  %v2386_v27 = vld [vmem:[#allocation7 + $0x210] sm:$0xff]   ;;  %v2393_v36 = vld [vmem:[#allocation7 + $0x140] sm:$0xff]  }
  0x72   : > { %2063 = vmatpush3.bf16.msra.mxu1 %v2351_v28  ;;  %2042 = vmatprep.subr.bf16.mxu0 %v2352_v29  ;;  %v291_v57 = vor.u32 %v290_v53, %v289_v52  ;;  %v2385_v28 = vld [vmem:[#allocation7 + $0x150] sm:$0xff]   ;;  %v2395_v37 = vld [vmem:[#allocation7 + $0x1c0] sm:$0xff]  }
  0x73   : > { %2064 = vmatprep.subr.bf16.mxu1 %v2353_v30  ;;  %v274_v58 = vsel %vm262_vm1, %v269_v55, %v273_v49  ;;  %v2387_v29 = vld [vmem:[#allocation7 + $0x1d0] sm:$0xff]   ;;  %v2388_v30 = vld [vmem:[#allocation7 + $0x188] sm:$0xff]  }
  0x74   : > { %651 = vmatprep.mubr.bf16.mxu0 %v274_v58  ;;  %v292_v60 = vsel %vm283_vm2, %v286_v56, %v291_v57  ;;  %v1933_v52 = vld [vmem:[%s2904_s2] ss:$0 sm:$0xff] }
  0x75   : > { %2043 = vmatpush3.bf16.msra.mxu0 %v2354_v31  ;;  %692 = vmatprep.mubr.bf16.mxu1 %v292_v60  ;;  %v2390_v31 = vld [vmem:[#allocation7 + $0x208] sm:$0xff]  }
  0x76   : > { %2065 = vmatpush3.bf16.msra.mxu1 %v2355_v32  ;;  %2187 = vmatprep.subr.bf16.mxu0 %v2611_v0  ;;  %v2389_v32 = vld [vmem:[#allocation7 + $0x148] sm:$0xff]  }
  0x77   : > { %2081 = vmatprep.subr.bf16.mxu1 %v2364_v6 }
  0x78   : > { %652 = vmatmul.mubr.bf16.vlgmr.msra.gmra.mxu0 %v260_v38 }
  0x79   : > { %693 = vmatmul.mubr.bf16.vlgmr.msra.gmra.mxu1 %v281_v59  ;;  %2188 = vmatpush3.bf16.msra.mxu0 %v2356_v54  ;;  %v1934_v54 = vld [vmem:[#allocation9] ss:$0 sm:$0xff] }
  0x7a   : > { %2189 = vmatprep.subr.bf16.mxu0 %v2611_v0  ;;  %2203 = vmatprep.mubr.msk.bf16.mxu0 %vm2612_vm4, %v2611_v0 }
  0x7b   : > { %2082 = vmatpush3.bf16.msra.mxu1 %v2365_v7 }
  0x7c   : > { %2083 = vmatprep.subr.bf16.mxu1 %v2368_v10 }
  0x7d   : > { %2190 = vmatpush3.bf16.msra.mxu0 %v2357_v61 }
  0x7e   : > { %2191 = vmatprep.subr.bf16.mxu0 %v2611_v0 }
  0x7f   : > { %2084 = vmatpush3.bf16.msra.mxu1 %v2369_v11 }
  0x80   : > { %2085 = vmatprep.subr.bf16.mxu1 %v2372_v14 }
  0x81   : > { %2192 = vmatpush3.bf16.msra.mxu0 %v2358_v62 }
  0x82   : > { %2193 = vmatprep.subr.bf16.mxu0 %v2611_v0 }
  0x83   : > { %2086 = vmatpush3.bf16.msra.mxu1 %v2373_v15 }
  0x84   : > { %2087 = vmatprep.subr.bf16.mxu1 %v2376_v18 }
  0x85   : > { %2194 = vmatpush3.bf16.msra.mxu0 %v2359_v63 }
  0x86   : > { %2195 = vmatprep.subr.bf16.mxu0 %v2611_v0 }
  0x87   : > { %2088 = vmatpush3.bf16.msra.mxu1 %v2377_v19 }
  0x88   : > { %2089 = vmatprep.subr.bf16.mxu1 %v2380_v22 }
  0x89   : > { %2196 = vmatpush3.bf16.msra.mxu0 %v2360_v1 }
  0x8a   : > { %2197 = vmatprep.subr.bf16.mxu0 %v2611_v0 }
  0x8b   : > { %2090 = vmatpush3.bf16.msra.mxu1 %v2381_v23  ;;  %v2396_v23 = vld [vmem:[#allocation7 + $0x278] sm:$0xff]  }
  0x8c   : > { %2091 = vmatprep.subr.bf16.mxu1 %v2384_v26 }
  0x8d   : > { %2198 = vmatpush3.bf16.msra.mxu0 %v2361_v2 }
  0x8e   : > { %2199 = vmatprep.subr.bf16.mxu0 %v2611_v0 }
  0x8f   : > { %2092 = vmatpush3.bf16.msra.mxu1 %v2385_v28  ;;  %v2398_v28 = vld [vmem:[#allocation7 + $0x268] sm:$0xff]  }
  0x90   : > { %2093 = vmatprep.subr.bf16.mxu1 %v2388_v30  ;;  %v2400_v30 = vld [vmem:[#allocation7 + $0x258] sm:$0xff]  }
  0x91   : > { %2200 = vmatpush3.bf16.msra.mxu0 %v2362_v3 }
  0x92   : > { %2201 = vmatprep.subr.bf16.mxu0 %v2611_v0 }
  0x93   : > { %2094 = vmatpush3.bf16.msra.mxu1 %v2389_v32  ;;  %v2402_v32 = vld [vmem:[#allocation7 + $0x248] sm:$0xff]  }
  0x94   : > { %2095 = vmatprep.subr.bf16.mxu1 %v2392_v34 }
  0x95   : > { %2202 = vmatpush3.bf16.msra.mxu0 %v2363_v4 }
  0x96   : > { %2103 = vmatprep.subr.bf16.mxu0 %v2366_v8 }
  0x97   : > { %2096 = vmatpush3.bf16.msra.mxu1 %v2393_v36 }
  0x98   : > { %2204 = vmatmul.mubr.bf16.vlgmr.msra.gmra.mxu0 %v297_v5  ;;  %2207 = vmatprep.subr.bf16.mxu1 %v2611_v0 }
  0x99   : > { %2104 = vmatpush3.bf16.msra.mxu0 %v2367_v9 }
  0x9a   : > { %2105 = vmatprep.subr.bf16.mxu0 %v2370_v12 }
  0x9d   : > { %2106 = vmatpush3.bf16.msra.mxu0 %v2371_v13 }
  0x9e   : > { %2107 = vmatprep.subr.bf16.mxu0 %v2374_v16 }
  0xa1   : > { %2108 = vmatpush3.bf16.msra.mxu0 %v2375_v17 }
  0xa2   : > { %2109 = vmatprep.subr.bf16.mxu0 %v2378_v20 }
  0xa5   : > { %2110 = vmatpush3.bf16.msra.mxu0 %v2379_v21 }
  0xa6   : > { %2111 = vmatprep.subr.bf16.mxu0 %v2382_v24 }
  0xa9   : > { %2112 = vmatpush3.bf16.msra.mxu0 %v2383_v25 }
  0xaa   : > { %2113 = vmatprep.subr.bf16.mxu0 %v2386_v27  ;;  %v2397_v27 = vld [vmem:[#allocation7 + $0x270] sm:$0xff]  }
  0xad   : > { %2114 = vmatpush3.bf16.msra.mxu0 %v2387_v29  ;;  %v2399_v29 = vld [vmem:[#allocation7 + $0x260] sm:$0xff]  }
  0xae   : > { %2115 = vmatprep.subr.bf16.mxu0 %v2390_v31  ;;  %v2401_v31 = vld [vmem:[#allocation7 + $0x250] sm:$0xff]  }
  0xb1   : > { %2116 = vmatpush3.bf16.msra.mxu0 %v2391_v33  ;;  %v2403_v33 = vld [vmem:[#allocation7 + $0x240] sm:$0xff]  }
  0xb2   : > { %2117 = vmatprep.subr.bf16.mxu0 %v2394_v35 }
  0xb5   : > { %2118 = vmatpush3.bf16.msra.mxu0 %v2395_v37  ;;  %v2404_v37 = vld [vmem:[#allocation7 + $0x2f8] sm:$0xff]  }
  0xb6   : > { %2134 = vmatprep.subr.bf16.mxu0 %v2404_v37 }
 0x138   : > { %v2044_v38 = vpop.f32.mrf.mxu0 }
 0x139   : > { %v2066_v39 = vpop.f32.mrf.mxu1 }
 0x13a   : > { %v2045_v40 = vpop.f32.mrf.mxu0 }
 0x13b   : > { %v2067_v41 = vpop.f32.mrf.mxu1  ;;  %v2046_v44 = vadd.f32 %v2045_v40, %v2044_v38  ;;  %v2405_v38 = vld [vmem:[#allocation7 + $0x2b8] sm:$0xff]  }
 0x13c   : > { %v2047_v42 = vpop.f32.mrf.mxu0  ;;  %v2068_v45 = vadd.f32 %v2067_v41, %v2066_v39  ;;  %v2406_v39 = vld [vmem:[#allocation7 + $0x378] sm:$0xff]   ;;  %v2408_v41 = vld [vmem:[#allocation7 + $0x2f0] sm:$0xff]  }
 0x13d   : > { %v2069_v43 = vpop.f32.mrf.mxu1  ;;  %v2407_v40 = vld [vmem:[#allocation7 + $0x338] sm:$0xff]  }
 0x13e   : > { %v2048_v46 = vpop.f32.mrf.mxu0  ;;  %v695_v50 = vadd.f32 %v2068_v45, %v2046_v44  ;;  %v2411_v44 = vld [vmem:[#allocation7 + $0x330] sm:$0xff]   ;;  %v2412_v45 = vld [vmem:[#allocation7 + $0x2e8] sm:$0xff]  }
 0x13f   : > { %v2070_v47 = vpop.f32.mrf.mxu1  ;;  %v2049_v48 = vadd.f32 %v2048_v46, %v2047_v42  ;;  %v2409_v42 = vld [vmem:[#allocation7 + $0x2b0] sm:$0xff]   ;;  %v2413_v46 = vld [vmem:[#allocation7 + $0x2a8] sm:$0xff]  }
 0x140   : > { %v2071_v49 = vadd.f32 %v2070_v47, %v2069_v43  ;;  %v2410_v43 = vld [vmem:[#allocation7 + $0x370] sm:$0xff]   ;;  %v2414_v47 = vld [vmem:[#allocation7 + $0x368] sm:$0xff]  }
 0x142   : > { %v698_v57 = vadd.f32 %v2071_v49, %v2049_v48  ;;  %v2415_v48 = vld [vmem:[#allocation7 + $0x328] sm:$0xff]   ;;  %v2416_v49 = vld [vmem:[#allocation7 + $0x2e0] sm:$0xff]  }
 0x158   : > { %v735_v51 = vpop.f32.mrf.mxu0 }
 0x159   : > { %v736_v53 = vadd.f32 %v735_v51, %v695_v50  ;;  %v2417_v50 = vld [vmem:[#allocation7 + $0x2a0] sm:$0xff]  }
 0x15a   : > { %v2205_v55 = vpop.f32.mrf.mxu0  ;;  %v2418_v51 = vld [vmem:[#allocation7 + $0x360] sm:$0xff]  }
 0x15b   : > { %v749_v56 = vmul.f32 %v1933_v52, %v736_v53  ;;  %v2420_v53 = vld [vmem:[#allocation7 + $0x2d8] sm:$0xff]  }
 0x15c   : > { %v738_v58 = vpop.f32.mrf.mxu0  ;;  %v2422_v55 = vld [vmem:[#allocation7 + $0x358] sm:$0xff]  }
 0x15d   : > { %v758_v59 = vadd.f32 %v1934_v54, %v749_v56  ;;  %v739_v60 = vadd.f32 %v738_v58, %v698_v57  ;;  %v2423_v56 = vld [vmem:[#allocation7 + $0x318] sm:$0xff]   ;;  %v2424_v57 = vld [vmem:[#allocation7 + $0x2d0] sm:$0xff]  }
 0x15e   : > { %v2206_v61 = vpop.f32.mrf.mxu0  ;;  %v2426_v58 = vld [vmem:[#allocation7 + $0x350] sm:$0xff]  }
 0x15f   : > { %2444 = vtanh.f32 %v758_v59  ;;  %v750_v62 = vmul.f32 %v1933_v52, %v739_v60  ;;  %v2419_v52 = vld [vmem:[#allocation7 + $0x320] sm:$0xff]   ;;  %v2425_v59 = vld [vmem:[#allocation7 + $0x290] sm:$0xff]   ;;  %v2428_v61 = vld [vmem:[#allocation7 + $0x2c8] sm:$0xff]  }
 0x160   : > { %v2427_v60 = vld [vmem:[#allocation7 + $0x310] sm:$0xff]  }
 0x161   : > { %v759_v63 = vadd.f32 %v1934_v54, %v750_v62  ;;  %v2421_v54 = vld [vmem:[#allocation7 + $0x298] sm:$0xff]   ;;  %v2430_v62 = vld [vmem:[#allocation7 + $0x348] sm:$0xff]  }
 0x163   : > { %2446 = vtanh.f32 %v759_v63  ;;  %v2429_v63 = vld [vmem:[#allocation7 + $0x288] sm:$0xff]  }
 0x16c   : > { %v2445_v1 = vpop.eup %2444 }
 0x16d   : > { %762 = vst [vmem:[#allocation3 + $0x2] sm:$0xff] %v2445_v1  ;;  %v2431_v1 = vld [vmem:[#allocation7 + $0x308] sm:$0xff]  }
 0x170   : > { %v2447_v2 = vpop.eup %2446 }
 0x171   : > { %763 = vst [vmem:[#allocation3 + $0xa] sm:$0xff] %v2447_v2  ;;  %v2432_v2 = vld [vmem:[#allocation7 + $0x2c0] sm:$0xff]  }
 0x174   : > { %v764_v3 = vld [vmem:[#allocation3] sm:$0xff] }
 0x178   : > { %v765_v4 = vld [vmem:[#allocation3 + $0x8] sm:$0xff]  ;;  %v766_v5 = vld [vmem:[#allocation3 + $0x10] sm:$0xf] }
 0x179   : > { %v767_v6 = vpack.c.bf16 %v765_v4, %v764_v3  ;;  %v768_v7 = vpack.c.bf16 %v766_v5, %v766_v5  ;;  %v2434_v3 = vld [vmem:[#allocation7 + $0x340] sm:$0xff]  }
 0x17a   : > { %v2433_v4 = vld [vmem:[#allocation7 + $0x280] sm:$0xff]  }
 0x17b   : > { %v770_v8 = vshrl.u32 %v767_v6, 16  ;;  %v772_v9 = vshll.u32 %v767_v6, 16  ;;  %v777_v10 = vshll.u32 %v768_v7, 16  ;;  %v791_v11 = vshrl.u32 %v768_v7, 16  ;;  %v2435_v5 = vld [vmem:[#allocation7 + $0x300] sm:$0xff]  }
 0x17c   : > { %v784_v17 = vrot.slane %v767_v6, 1  ;;  %v785_v21 = vrot.slane %v768_v7, 1  ;;  %v798_v34 = vrot.slane %v767_v6, 2  ;;  %v799_v35 = vrot.slane %v768_v7, 2 }
 0x17d   : > { %v774_v12 = vrot.slane %v772_v9, 1  ;;  %v788_v13 = vrot.slane %v770_v8, 1  ;;  %v789_v14 = vrot.slane %v772_v9, 2  ;;  %v793_v15 = vrot.slane %v791_v11, 1 }
 0x17e   : > { %v794_v16 = vrot.slane %v777_v10, 2  ;;  %v779_v19 = vrot.slane %v777_v10, 1  ;;  %v786_v26 = vsel %vm278_vm3, %v784_v17, %v785_v21  ;;  %v800_v36 = vsel %vm294_vm5, %v798_v34, %v799_v35 }
 0x17f   : > { %v775_v18 = vor.u32 %v774_v12, %v770_v8  ;;  %v790_v20 = vor.u32 %v789_v14, %v788_v13 }
 0x180   : > { %v795_v22 = vor.u32 %v794_v16, %v793_v15 }
 0x181   : > { %v780_v24 = vsel %vm262_vm1, %v775_v18, %v779_v19 }
 0x182   : > { %1155 = vmatprep.mubr.bf16.mxu1 %v780_v24  ;;  %v796_v25 = vsel %vm283_vm2, %v790_v20, %v795_v22  ;;  %v1976_v20 = vld [vmem:[%s2904_s2 + $0x1] ss:$0 sm:$0xff]  ;;  %v1977_v22 = vld [vmem:[#allocation9 + $0x1] ss:$0 sm:$0xff] }
 0x183   : > { %1196 = vmatprep.mubr.bf16.mxu0 %v796_v25  ;;  %1156 = vmatmul.mubr.bf16.vlgmr.msra.gmra.mxu1 %v767_v6 }
 0x184   : > { %1197 = vmatmul.mubr.bf16.vlgmr.msra.gmra.mxu0 %v786_v26  ;;  %2208 = vmatpush3.bf16.msra.mxu1 %v2396_v23 }
 0x185   : > { %2209 = vmatprep.subr.bf16.mxu1 %v2611_v0  ;;  %2223 = vmatprep.mubr.msk.bf16.mxu1 %vm2612_vm4, %v2611_v0 }
 0x186   : > { %2135 = vmatpush3.bf16.msra.mxu0 %v2405_v38 }
 0x187   : > { %2136 = vmatprep.subr.bf16.mxu0 %v2408_v41 }
 0x188   : > { %2210 = vmatpush3.bf16.msra.mxu1 %v2397_v27 }
 0x189   : > { %2211 = vmatprep.subr.bf16.mxu1 %v2611_v0 }
 0x18a   : > { %2137 = vmatpush3.bf16.msra.mxu0 %v2409_v42 }
 0x18b   : > { %2138 = vmatprep.subr.bf16.mxu0 %v2412_v45 }
 0x18c   : > { %2212 = vmatpush3.bf16.msra.mxu1 %v2398_v28 }
 0x18d   : > { %2213 = vmatprep.subr.bf16.mxu1 %v2611_v0 }
 0x18e   : > { %2139 = vmatpush3.bf16.msra.mxu0 %v2413_v46 }
 0x18f   : > { %2140 = vmatprep.subr.bf16.mxu0 %v2416_v49 }
 0x190   : > { %2214 = vmatpush3.bf16.msra.mxu1 %v2399_v29 }
 0x191   : > { %2215 = vmatprep.subr.bf16.mxu1 %v2611_v0 }
 0x192   : > { %2141 = vmatpush3.bf16.msra.mxu0 %v2417_v50 }
 0x193   : > { %2142 = vmatprep.subr.bf16.mxu0 %v2420_v53 }
 0x194   : > { %2216 = vmatpush3.bf16.msra.mxu1 %v2400_v30 }
 0x195   : > { %2217 = vmatprep.subr.bf16.mxu1 %v2611_v0 }
 0x196   : > { %2143 = vmatpush3.bf16.msra.mxu0 %v2421_v54  ;;  %v2436_v54 = vld [vmem:[#allocation7 + $0x3b8] sm:$0xff]  }
 0x197   : > { %2144 = vmatprep.subr.bf16.mxu0 %v2424_v57 }
 0x198   : > { %2218 = vmatpush3.bf16.msra.mxu1 %v2401_v31 }
 0x199   : > { %2219 = vmatprep.subr.bf16.mxu1 %v2611_v0 }
 0x19a   : > { %2145 = vmatpush3.bf16.msra.mxu0 %v2425_v59  ;;  %v2438_v59 = vld [vmem:[#allocation7 + $0x3a8] sm:$0xff]  }
 0x19b   : > { %2146 = vmatprep.subr.bf16.mxu0 %v2428_v61  ;;  %v2440_v61 = vld [vmem:[#allocation7 + $0x398] sm:$0xff]  }
 0x19c   : > { %2220 = vmatpush3.bf16.msra.mxu1 %v2402_v32 }
 0x19d   : > { %2221 = vmatprep.subr.bf16.mxu1 %v2611_v0 }
 0x19e   : > { %2147 = vmatpush3.bf16.msra.mxu0 %v2429_v63  ;;  %v2442_v63 = vld [vmem:[#allocation7 + $0x388] sm:$0xff]  }
 0x19f   : > { %2148 = vmatprep.subr.bf16.mxu0 %v2432_v2 }
 0x1a0   : > { %2222 = vmatpush3.bf16.msra.mxu1 %v2403_v33 }
 0x1a1   : > { %2156 = vmatprep.subr.bf16.mxu1 %v2406_v39 }
 0x1a2   : > { %2149 = vmatpush3.bf16.msra.mxu0 %v2433_v4 }
 0x1a3   : > { %2224 = vmatmul.mubr.bf16.vlgmr.msra.gmra.mxu1 %v800_v36  ;;  %2227 = vmatprep.subr.bf16.mxu0 %v2611_v0 }
 0x1a4   : > { %2157 = vmatpush3.bf16.msra.mxu1 %v2407_v40 }
 0x1a5   : > { %2158 = vmatprep.subr.bf16.mxu1 %v2410_v43 }
 0x1a8   : > { %2159 = vmatpush3.bf16.msra.mxu1 %v2411_v44 }
 0x1a9   : > { %2160 = vmatprep.subr.bf16.mxu1 %v2414_v47 }
 0x1ac   : > { %2161 = vmatpush3.bf16.msra.mxu1 %v2415_v48 }
 0x1ad   : > { %2162 = vmatprep.subr.bf16.mxu1 %v2418_v51 }
 0x1b0   : > { %2163 = vmatpush3.bf16.msra.mxu1 %v2419_v52 }
 0x1b1   : > { %2164 = vmatprep.subr.bf16.mxu1 %v2422_v55 }
 0x1b4   : > { %2165 = vmatpush3.bf16.msra.mxu1 %v2423_v56 }
 0x1b5   : > { %2166 = vmatprep.subr.bf16.mxu1 %v2426_v58  ;;  %v2437_v58 = vld [vmem:[#allocation7 + $0x3b0] sm:$0xff]  }
 0x1b8   : > { %2167 = vmatpush3.bf16.msra.mxu1 %v2427_v60  ;;  %v2439_v60 = vld [vmem:[#allocation7 + $0x3a0] sm:$0xff]  }
 0x1b9   : > { %2168 = vmatprep.subr.bf16.mxu1 %v2430_v62  ;;  %v2441_v62 = vld [vmem:[#allocation7 + $0x390] sm:$0xff]  }
 0x1bc   : > { %2169 = vmatpush3.bf16.msra.mxu1 %v2431_v1  ;;  %v2443_v1 = vld [vmem:[#allocation7 + $0x380] sm:$0xff]  }
 0x1bd   : > { %2170 = vmatprep.subr.bf16.mxu1 %v2434_v3 }
 0x1c0   : > { %2171 = vmatpush3.bf16.msra.mxu1 %v2435_v5 }
 0x243   : > { %v2097_v6 = vpop.f32.mrf.mxu1 }
 0x244   : > { %v2119_v7 = vpop.f32.mrf.mxu0 }
 0x245   : > { %v2098_v8 = vpop.f32.mrf.mxu1 }
 0x246   : > { %v2120_v9 = vpop.f32.mrf.mxu0  ;;  %v2099_v12 = vadd.f32 %v2098_v8, %v2097_v6 }
 0x247   : > { %v2100_v10 = vpop.f32.mrf.mxu1  ;;  %v2121_v13 = vadd.f32 %v2120_v9, %v2119_v7 }
 0x248   : > { %v2122_v11 = vpop.f32.mrf.mxu0 }
 0x249   : > { %v2101_v14 = vpop.f32.mrf.mxu1  ;;  %v1199_v18 = vadd.f32 %v2121_v13, %v2099_v12 }
 0x24a   : > { %v2123_v15 = vpop.f32.mrf.mxu0  ;;  %v2102_v16 = vadd.f32 %v2101_v14, %v2100_v10 }
 0x24b   : > { %v2124_v17 = vadd.f32 %v2123_v15, %v2122_v11 }
 0x24d   : > { %v1202_v25 = vadd.f32 %v2124_v17, %v2102_v16 }
 0x263   : > { %v1239_v19 = vpop.f32.mrf.mxu1 }
 0x264   : > { %v1240_v21 = vadd.f32 %v1239_v19, %v1199_v18  ;;  %v2019_v18 = vld [vmem:[%s2904_s2 + $0x2] ss:$0 sm:$0xff] }
 0x265   : > { %v2225_v23 = vpop.f32.mrf.mxu1 }
 0x266   : > { %v1254_v24 = vmul.f32 %v1976_v20, %v1240_v21 }
 0x267   : > { %v1242_v26 = vpop.f32.mrf.mxu1 }
 0x268   : > { %v1264_v27 = vadd.f32 %v1977_v22, %v1254_v24  ;;  %v1243_v28 = vadd.f32 %v1242_v26, %v1202_v25 }
 0x269   : > { %v2226_v29 = vpop.f32.mrf.mxu1 }
 0x26a   : > { %2448 = vtanh.f32 %v1264_v27  ;;  %v1255_v30 = vmul.f32 %v1976_v20, %v1243_v28  ;;  %v2020_v20 = vld [vmem:[#allocation9 + $0x2] ss:$0 sm:$0xff] }
 0x26c   : > { %v1265_v31 = vadd.f32 %v1977_v22, %v1255_v30 }
 0x26e   : > { %2450 = vtanh.f32 %v1265_v31 }
 0x277   : > { %v2449_v32 = vpop.eup %2448 }
 0x278   : > { %1268 = vst [vmem:[#allocation2 + $0x2] sm:$0xff] %v2449_v32 }
 0x27b   : > { %v2451_v33 = vpop.eup %2450 }
 0x27c   : > { %1269 = vst [vmem:[#allocation2 + $0xa] sm:$0xff] %v2451_v33 }
 0x27f   : > { %v1270_v34 = vld [vmem:[#allocation2] sm:$0xff] }
 0x283   : > { %v1271_v35 = vld [vmem:[#allocation2 + $0x8] sm:$0xff]  ;;  %v1272_v36 = vld [vmem:[#allocation2 + $0x10] sm:$0xf] }
 0x284   : > { %v1273_v37 = vpack.c.bf16 %v1271_v35, %v1270_v34  ;;  %v1274_v38 = vpack.c.bf16 %v1272_v36, %v1272_v36 }
 0x286   : > { %v1276_v39 = vshrl.u32 %v1273_v37, 16  ;;  %v1278_v40 = vshll.u32 %v1273_v37, 16  ;;  %v1283_v41 = vshll.u32 %v1274_v38, 16  ;;  %v1297_v42 = vshrl.u32 %v1274_v38, 16 }
 0x287   : > { %v1290_v48 = vrot.slane %v1273_v37, 1  ;;  %v1291_v52 = vrot.slane %v1274_v38, 1  ;;  %v1304_v2 = vrot.slane %v1273_v37, 2  ;;  %v1305_v3 = vrot.slane %v1274_v38, 2 }
 0x288   : > { %v1280_v43 = vrot.slane %v1278_v40, 1  ;;  %v1294_v44 = vrot.slane %v1276_v39, 1  ;;  %v1295_v45 = vrot.slane %v1278_v40, 2  ;;  %v1299_v46 = vrot.slane %v1297_v42, 1 }
 0x289   : > { %v1300_v47 = vrot.slane %v1283_v41, 2  ;;  %v1285_v50 = vrot.slane %v1283_v41, 1  ;;  %v1292_v57 = vsel %vm278_vm3, %v1290_v48, %v1291_v52  ;;  %v1306_v4 = vsel %vm294_vm5, %v1304_v2, %v1305_v3 }
 0x28a   : > { %v1281_v49 = vor.u32 %v1280_v43, %v1276_v39  ;;  %v1296_v51 = vor.u32 %v1295_v45, %v1294_v44 }
 0x28b   : > { %v1301_v53 = vor.u32 %v1300_v47, %v1299_v46 }
 0x28c   : > { %v1286_v55 = vsel %vm262_vm1, %v1281_v49, %v1285_v50 }
 0x28d   : > { %1661 = vmatprep.mubr.bf16.mxu0 %v1286_v55  ;;  %v1302_v56 = vsel %vm283_vm2, %v1296_v51, %v1301_v53 }
 0x28e   : > { %1702 = vmatprep.mubr.bf16.mxu1 %v1302_v56  ;;  %1662 = vmatmul.mubr.bf16.vlgmr.msra.gmra.mxu0 %v1273_v37 }
 0x28f   : > { %1703 = vmatmul.mubr.bf16.vlgmr.msra.gmra.mxu1 %v1292_v57  ;;  %2228 = vmatpush3.bf16.msra.mxu0 %v2436_v54 }
 0x290   : > { %2229 = vmatprep.subr.bf16.mxu0 %v2611_v0  ;;  %2243 = vmatprep.mubr.msk.bf16.mxu0 %vm2612_vm4, %v2611_v0 }
 0x293   : > { %2230 = vmatpush3.bf16.msra.mxu0 %v2437_v58 }
 0x294   : > { %2231 = vmatprep.subr.bf16.mxu0 %v2611_v0 }
 0x297   : > { %2232 = vmatpush3.bf16.msra.mxu0 %v2438_v59 }
 0x298   : > { %2233 = vmatprep.subr.bf16.mxu0 %v2611_v0 }
 0x29b   : > { %2234 = vmatpush3.bf16.msra.mxu0 %v2439_v60 }
 0x29c   : > { %2235 = vmatprep.subr.bf16.mxu0 %v2611_v0 }
 0x29f   : > { %2236 = vmatpush3.bf16.msra.mxu0 %v2440_v61 }
 0x2a0   : > { %2237 = vmatprep.subr.bf16.mxu0 %v2611_v0 }
 0x2a3   : > { %2238 = vmatpush3.bf16.msra.mxu0 %v2441_v62 }
 0x2a4   : > { %2239 = vmatprep.subr.bf16.mxu0 %v2611_v0 }
 0x2a7   : > { %2240 = vmatpush3.bf16.msra.mxu0 %v2442_v63 }
 0x2a8   : > { %2241 = vmatprep.subr.bf16.mxu0 %v2611_v0 }
 0x2ab   : > { %2242 = vmatpush3.bf16.msra.mxu0 %v2443_v1 }
 0x2ae   : > { %2244 = vmatmul.mubr.bf16.vlgmr.msra.gmra.mxu0 %v1306_v4 }
 0x34e   : > { %v2150_v5 = vpop.f32.mrf.mxu0 }
 0x34f   : > { %v2172_v6 = vpop.f32.mrf.mxu1 }
 0x350   : > { %v2151_v7 = vpop.f32.mrf.mxu0 }
 0x351   : > { %v2173_v8 = vpop.f32.mrf.mxu1  ;;  %v2152_v11 = vadd.f32 %v2151_v7, %v2150_v5 }
 0x352   : > { %v2153_v9 = vpop.f32.mrf.mxu0  ;;  %v2174_v12 = vadd.f32 %v2173_v8, %v2172_v6 }
 0x353   : > { %v2175_v10 = vpop.f32.mrf.mxu1 }
 0x354   : > { %v2154_v13 = vpop.f32.mrf.mxu0  ;;  %v1705_v16 = vadd.f32 %v2174_v12, %v2152_v11 }
 0x355   : > { %v2176_v14 = vpop.f32.mrf.mxu1  ;;  %v2155_v15 = vadd.f32 %v2154_v13, %v2153_v9 }
 0x356   : > { %v2177_v0 = vadd.f32 %v2176_v14, %v2175_v10 }
 0x358   : > { %v1708_v23 = vadd.f32 %v2177_v0, %v2155_v15 }
 0x36e   : > { %v1745_v17 = vpop.f32.mrf.mxu0 }
 0x36f   : > { %v1746_v19 = vadd.f32 %v1745_v17, %v1705_v16 }
 0x370   : > { %v2245_v21 = vpop.f32.mrf.mxu0 }
 0x371   : > { %v1760_v22 = vmul.f32 %v2019_v18, %v1746_v19 }
 0x372   : > { %v1748_v24 = vpop.f32.mrf.mxu0 }
 0x373   : > { %v1770_v25 = vadd.f32 %v2020_v20, %v1760_v22  ;;  %v1749_v26 = vadd.f32 %v1748_v24, %v1708_v23 }
 0x374   : > { %v2246_v27 = vpop.f32.mrf.mxu0 }
 0x375   : > { %1772 = vst [vmem:[%s244_s29] sm:$0xff] %v1770_v25  ;;  %v1761_v28 = vmul.f32 %v2019_v18, %v1749_v26 }
 0x377   : > { %v1771_v29 = vadd.f32 %v2020_v20, %v1761_v28 }
 0x379   : > { %1773 = vst [vmem:[%s244_s29 + $0x8] sm:$0xff] %v1771_v29 }
 0x37a   : > { %2545 = shalt.err (!%p2542_p5)
}
 0x37b   : > { %s2546_s21 = scalar_lea.hbm %s2859_s7, 256  ;;  %s2550_s8 = scalar_lea.hbm %s2906_s4, 512 }
 0x37c   : > { %p2547_p11 = scmp.ne.s32.totalorder %s2859_s7, %s2546_s21  ;;  %p2551_p4 = scmp.lt.s32.totalorder %s2859_s7, %s2906_s4 }
 0x37d   : > { %p2552_p6 = scmp.lt.s32.totalorder %s2550_s8, %s2546_s21 }
 0x37e   : > { %p2548_p9 = pnand %p2547_p11, %p2921_p2 }
 0x37f   : > { %p2553_p8 = por %p2552_p6, %p2551_p4 }
 0x380   : > { %p2549_p1 = pneg %p2548_p9 }
 0x382   : > { %p2554_p10 = pnand %p2553_p8, %p2549_p1 }
 0x384   : > { %2557 = shalt.err (!%p2554_p10)
}
 0x385   : > { %s2614_s29 = smov 128   ;;  %s2615_s28 = smov 8  }
 0x386   : > { %2257 = dma.vmem_to_hbm [thread:$0]  (%p2921_p2), %s2854_s26, 256, %s2859_s7, %s1775_s11, %s2614_s29, %s2614_s29, %s2615_s28  }
 0x387 PF: > { %s1803_s30 = sand.u32 1, %s2588_s15   ;;  %p2922_p7 = scmp.ne.s32.totalorder %s2912_s22, 0 }
 0x388   : > { %p2923_p12 = scmp.ge.s32.totalorder %s2600_s18, 2  ;;  %s1804_s5 = scalar_lea.sflag [#allocation6], %s1803_s30 }
 0x38a   : > { %p2271_p13 = pnand %p2923_p12, %p2922_p7 }
 0x38c   : > { %p2272_p0 = pneg %p2271_p13 }
 0x38e   : > { %2583 = dma.done.wait (%p2272_p0), %s1804_s5, 256  }
 0x38f   : > { %2585 = vsyncadd (%p2272_p0), %s1804_s5, 4294967040  ;;  %p18_p3 = scmp.ge.s32.totalorder %s2721_s14, 4   ;;  %s2924_s15 = smov %s2592_s16 }
 0x390   : > { %s2925_s16 = smov %s2596_s17  ;;  %s2926_s17 = smov %s2730_s25 }
 0x391   : > { %s2927_s18 = smov %s2721_s14  ;;  %20 = sbr.rel (!%p18_p3) target bundleno = 6 (0x6), region = 95 }
 0x396   :  { %1809 = vsyncpa [#allocation5], 1 }
 0x397   :  { %1811 = vsyncpa [#allocation5 + $0x1], 1 }
 0x398   :  { %1812 = vsyncpa [#allocation8], 1 }
 0x399   :  { %1813 = vsyncpa [#allocation6], 1 }
 0x39a   :  { %1815 = vsyncpa [#allocation6 + $0x1], 1 }

</bundles_post_ra>
